<compile_context>
chip_gen: v5e
topology: v5e:2x2
jax: 0.10.0
libtpu: 0.0.40
codegen_flags: <defaults>
</compile_context>

<pallas_src>
import functools

import jax
import jax.numpy as jnp
from jax.experimental import pallas as pl
from jax.experimental.pallas import tpu as pltpu

H1, H2 = 100, 500          # logical hidden widths (PyTorch module)
H1P, H2P = 128, 512        # lane-aligned padded widths used by the kernel


def _round_up(n, m):
    return ((n + m - 1) // m) * m


def _critic_kernel(x_ref, w1_ref, b1_ref, w2_ref, b2_ref, w3_ref, b3_ref, o_ref):
    # Layer 1: (TB, S) @ (S, 128) on the MXU, bias + ReLU on the VPU.
    h1 = jnp.dot(x_ref[...], w1_ref[...], preferred_element_type=jnp.float32)
    h1 = jnp.maximum(h1 + b1_ref[...], 0.0)
    # Layer 2: (TB, 128) @ (128, 512) on the MXU, bias + ReLU on the VPU.
    h2 = jnp.dot(h1, w2_ref[...], preferred_element_type=jnp.float32)
    h2 = jnp.maximum(h2 + b2_ref[...], 0.0)
    # Layer 3 (500 -> 1): VPU multiply + cross-lane reduction instead of an
    # N=1 MXU matmul; w3 is stored as a (1, 512) row.
    q = jnp.sum(h2 * w3_ref[...], axis=-1, keepdims=True) + b3_ref[...]
    o_ref[...] = q.astype(o_ref.dtype)


@functools.partial(jax.jit, static_argnames=("block_b",))
def critic_forward(x, w1, b1, w2, b2, w3_row, b3, *, block_b=512):
    """x: (B, state_space) f32; padded params from init_critic_params -> (B, 1) f32."""
    B, S = x.shape
    # Batch tile: sublane-aligned, capped at block_b (well under VMEM limits on
    # v5e/v6e/v7x even with double-buffered x tiles + resident weights).
    tb = _round_up(min(block_b, _round_up(B, 8)), 8)
    b_pad = _round_up(B, tb)
    if b_pad != B:
        x = jnp.pad(x, ((0, b_pad - B), (0, 0)))
    grid = (b_pad // tb,)

    resident = lambda i: (0, 0)  # weight/bias blocks: same block every step -> stay in VMEM
    out = pl.pallas_call(
        _critic_kernel,
        out_shape=jax.ShapeDtypeStruct((b_pad, 1), jnp.float32),
        grid=grid,
        in_specs=[
            pl.BlockSpec((tb, S), lambda i: (i, 0)),      # x: streamed batch tiles
            pl.BlockSpec((S, H1P), resident),             # w1
            pl.BlockSpec((1, H1P), resident),             # b1
            pl.BlockSpec((H1P, H2P), resident),           # w2
            pl.BlockSpec((1, H2P), resident),             # b2
            pl.BlockSpec((1, H2P), resident),             # w3 (row layout)
            pl.BlockSpec((1, 1), resident),               # b3
        ],
        out_specs=pl.BlockSpec((tb, 1), lambda i: (i, 0)),
        compiler_params=pltpu.CompilerParams(
            dimension_semantics=("parallel",),
        ),
    )(x, w1, b1, w2, b2, w3_row, b3)
    return out[:B]


def init_critic_params(key, state_space):
    """PyTorch nn.Linear default init U(-1/sqrt(fan_in), 1/sqrt(fan_in)),
    zero-padded to lane-aligned hidden widths (padding is mathematically inert)."""
    def linear(k, fan_in, fan_out):
        kw, kb = jax.random.split(k)
        bound = float(fan_in) ** -0.5
        w = jax.random.uniform(kw, (fan_in, fan_out), jnp.float32, -bound, bound)
        b = jax.random.uniform(kb, (1, fan_out), jnp.float32, -bound, bound)
        return w, b

    k1, k2, k3 = jax.random.split(key, 3)
    w1, b1 = linear(k1, state_space, H1)   # (S, 100), (1, 100)
    w2, b2 = linear(k2, H1, H2)            # (100, 500), (1, 500)
    w3, b3 = linear(k3, H2, 1)             # (500, 1), (1, 1)

    w1p = jnp.pad(w1, ((0, 0), (0, H1P - H1)))
    b1p = jnp.pad(b1, ((0, 0), (0, H1P - H1)))
    w2p = jnp.pad(w2, ((0, H1P - H1), (0, H2P - H2)))
    b2p = jnp.pad(b2, ((0, 0), (0, H2P - H2)))
    w3_row = jnp.pad(w3.T, ((0, 0), (0, H2P - H2)))  # stored as (1, 512) row
    return w1p, b1p, w2p, b2p, w3_row, b3


def critic_reference(x, w1p, b1p, w2p, b2p, w3_row, b3):
    """Pure-JAX reference using the ORIGINAL (unpadded) module parameters,
    recovered by slicing off the zero padding — exactly the PyTorch forward."""
    w1, b1 = w1p[:, :H1], b1p[:, :H1]
    w2, b2 = w2p[:H1, :H2], b2p[:, :H2]
    w3 = w3_row[:, :H2].T
    a1 = jnp.maximum(x @ w1 + b1, 0.0)
    a2 = jnp.maximum(a1 @ w2 + b2, 0.0)
    return a2 @ w3 + b3


if __name__ == "__main__":
    key = jax.random.PRNGKey(0)
    batch, state_space = 8, 32

    kx, kp = jax.random.split(key)
    x = jax.random.normal(kx, (batch, state_space), jnp.float32)
    params = init_critic_params(kp, state_space)

    q = critic_forward(x, *params)
    jax.block_until_ready(q)

    q_ref = critic_reference(x, *params)
    assert q.shape == (batch, 1)
    assert jnp.allclose(q, q_ref, atol=1e-4, rtol=1e-4)

    print("KERNEL_OK")
</pallas_src>

<mosaic_0001>
module attributes {stable_mosaic.version = 11 : i64} {
  func.func @_critic_kernel(%arg0: i32, %arg1: memref<8x32xf32, #tpu.memory_space<vmem>>, %arg2: memref<32x128xf32, #tpu.memory_space<vmem>>, %arg3: memref<1x128xf32, #tpu.memory_space<vmem>>, %arg4: memref<128x512xf32, #tpu.memory_space<vmem>>, %arg5: memref<1x512xf32, #tpu.memory_space<vmem>>, %arg6: memref<1x512xf32, #tpu.memory_space<vmem>>, %arg7: memref<1x1xf32, #tpu.memory_space<vmem>>, %arg8: memref<8x1xf32, #tpu.memory_space<vmem>>) attributes {dimension_semantics = [#tpu.dimension_semantics<parallel>], iteration_bounds = array<i64: 1>, scalar_prefetch = 0 : i64, scratch_operands = 0 : i64, tpu.core_type = #tpu.core_type<tc>, window_params = [{transform_indices = @transform_0, window_bounds = array<i64: 8, 32>}, {pipeline_mode = #tpu.pipeline_mode<synchronous>, transform_indices = @transform_1, window_bounds = array<i64: 32, 128>}, {pipeline_mode = #tpu.pipeline_mode<synchronous>, transform_indices = @transform_2, window_bounds = array<i64: 1, 128>}, {pipeline_mode = #tpu.pipeline_mode<synchronous>, transform_indices = @transform_3, window_bounds = array<i64: 128, 512>}, {pipeline_mode = #tpu.pipeline_mode<synchronous>, transform_indices = @transform_4, window_bounds = array<i64: 1, 512>}, {pipeline_mode = #tpu.pipeline_mode<synchronous>, transform_indices = @transform_5, window_bounds = array<i64: 1, 512>}, {pipeline_mode = #tpu.pipeline_mode<synchronous>, transform_indices = @transform_6, window_bounds = array<i64: 1, 1>}, {transform_indices = @transform_7, window_bounds = array<i64: 8, 1>}]} {
    %c0 = arith.constant 0 : index
    %c0_0 = arith.constant 0 : index
    %0 = vector.load %arg1[%c0, %c0_0] : memref<8x32xf32, #tpu.memory_space<vmem>>, vector<8x32xf32>
    %c0_1 = arith.constant 0 : index
    %c0_2 = arith.constant 0 : index
    %1 = vector.load %arg2[%c0_1, %c0_2] : memref<32x128xf32, #tpu.memory_space<vmem>>, vector<32x128xf32>
    %cst = arith.constant dense<0.000000e+00> : vector<8x128xf32>
    %2 = tpu.matmul %0, %1, %cst {dimension_numbers = #tpu.dot_dimension_numbers<[1], [0], [0], [1], [0, 0, 1, 1], [], []>} : vector<8x32xf32>, vector<32x128xf32>, vector<8x128xf32> -> vector<8x128xf32>
    %c0_3 = arith.constant 0 : index
    %c0_4 = arith.constant 0 : index
    %3 = vector.load %arg3[%c0_3, %c0_4] : memref<1x128xf32, #tpu.memory_space<vmem>>, vector<1x128xf32>
    %4 = vector.broadcast %3 : vector<1x128xf32> to vector<8x128xf32>
    %5 = arith.addf %2, %4 : vector<8x128xf32>
    %cst_5 = arith.constant 0.000000e+00 : f32
    %6 = vector.broadcast %cst_5 : f32 to vector<8x128xf32>
    %7 = arith.maximumf %5, %6 : vector<8x128xf32>
    %c0_6 = arith.constant 0 : index
    %c0_7 = arith.constant 0 : index
    %8 = vector.load %arg4[%c0_6, %c0_7] : memref<128x512xf32, #tpu.memory_space<vmem>>, vector<128x512xf32>
    %cst_8 = arith.constant dense<0.000000e+00> : vector<8x512xf32>
    %9 = tpu.matmul %7, %8, %cst_8 {dimension_numbers = #tpu.dot_dimension_numbers<[1], [0], [0], [1], [0, 0, 1, 1], [], []>} : vector<8x128xf32>, vector<128x512xf32>, vector<8x512xf32> -> vector<8x512xf32>
    %c0_9 = arith.constant 0 : index
    %c0_10 = arith.constant 0 : index
    %10 = vector.load %arg5[%c0_9, %c0_10] : memref<1x512xf32, #tpu.memory_space<vmem>>, vector<1x512xf32>
    %11 = vector.broadcast %10 : vector<1x512xf32> to vector<8x512xf32>
    %12 = arith.addf %9, %11 : vector<8x512xf32>
    %cst_11 = arith.constant 0.000000e+00 : f32
    %13 = vector.broadcast %cst_11 : f32 to vector<8x512xf32>
    %14 = arith.maximumf %12, %13 : vector<8x512xf32>
    %c0_12 = arith.constant 0 : index
    %c0_13 = arith.constant 0 : index
    %15 = vector.load %arg6[%c0_12, %c0_13] : memref<1x512xf32, #tpu.memory_space<vmem>>, vector<1x512xf32>
    %16 = vector.broadcast %15 : vector<1x512xf32> to vector<8x512xf32>
    %17 = arith.mulf %14, %16 : vector<8x512xf32>
    %cst_14 = arith.constant dense<0.000000e+00> : vector<8xf32>
    %18 = vector.multi_reduction <add>, %17, %cst_14 [1] : vector<8x512xf32> to vector<8xf32>
    %19 = vector.shape_cast %18 : vector<8xf32> to vector<8x1xf32>
    %c0_15 = arith.constant 0 : index
    %c0_16 = arith.constant 0 : index
    %20 = vector.load %arg7[%c0_15, %c0_16] : memref<1x1xf32, #tpu.memory_space<vmem>>, vector<1x1xf32>
    %21 = vector.broadcast %20 : vector<1x1xf32> to vector<8x1xf32>
    %22 = arith.addf %19, %21 : vector<8x1xf32>
    %c0_17 = arith.constant 0 : index
    %c0_18 = arith.constant 0 : index
    %23 = vector.load %arg8[%c0_17, %c0_18] : memref<8x1xf32, #tpu.memory_space<vmem>>, vector<8x1xf32>
    tpu.vector_store %arg8[%c0_17, %c0_18], %22 {strides = array<i32>} : memref<8x1xf32, #tpu.memory_space<vmem>>, vector<8x1xf32>,
    return
  }
  func.func @transform_0(%arg0: i32) -> (i32, i32) {
    %c0_i32 = arith.constant 0 : i32
    %c0_i32_0 = arith.constant 0 : i32
    return %arg0, %c0_i32 : i32, i32
  }
  func.func @transform_1(%arg0: i32) -> (i32, i32) {
    %c0_i32 = arith.constant 0 : i32
    %c0_i32_0 = arith.constant 0 : i32
    %c0_i32_1 = arith.constant 0 : i32
    return %c0_i32, %c0_i32_0 : i32, i32
  }
  func.func @transform_2(%arg0: i32) -> (i32, i32) {
    %c0_i32 = arith.constant 0 : i32
    %c0_i32_0 = arith.constant 0 : i32
    %c0_i32_1 = arith.constant 0 : i32
    return %c0_i32, %c0_i32_0 : i32, i32
  }
  func.func @transform_3(%arg0: i32) -> (i32, i32) {
    %c0_i32 = arith.constant 0 : i32
    %c0_i32_0 = arith.constant 0 : i32
    %c0_i32_1 = arith.constant 0 : i32
    return %c0_i32, %c0_i32_0 : i32, i32
  }
  func.func @transform_4(%arg0: i32) -> (i32, i32) {
    %c0_i32 = arith.constant 0 : i32
    %c0_i32_0 = arith.constant 0 : i32
    %c0_i32_1 = arith.constant 0 : i32
    return %c0_i32, %c0_i32_0 : i32, i32
  }
  func.func @transform_5(%arg0: i32) -> (i32, i32) {
    %c0_i32 = arith.constant 0 : i32
    %c0_i32_0 = arith.constant 0 : i32
    %c0_i32_1 = arith.constant 0 : i32
    return %c0_i32, %c0_i32_0 : i32, i32
  }
  func.func @transform_6(%arg0: i32) -> (i32, i32) {
    %c0_i32 = arith.constant 0 : i32
    %c0_i32_0 = arith.constant 0 : i32
    %c0_i32_1 = arith.constant 0 : i32
    return %c0_i32, %c0_i32_0 : i32, i32
  }
  func.func @transform_7(%arg0: i32) -> (i32, i32) {
    %c0_i32 = arith.constant 0 : i32
    %c0_i32_0 = arith.constant 0 : i32
    return %arg0, %c0_i32 : i32, i32
  }
}

</mosaic_0001>

<bundles_post_ra>
// kernel: critic_forward.1
= control target key start
LH: loop header
LB: loop body
LE: loop exit
PB: predicated region body
PF: predicated region fallthrough
CT: control target
= control target key end

     0   :  { %s497_s0 = inlined_call_operand.hbm [shape: f32[8,32], index: 0, kind: input, shape index: {}]   ;;  %s498_s1 = inlined_call_operand.hbm [shape: f32[32,128], index: 1, kind: input, shape index: {}]   ;;  %s499_s2 = inlined_call_operand.vmem [shape: f32[1,128], index: 2, kind: input, shape index: {}]   ;;  %s500_s3 = inlined_call_operand.hbm [shape: f32[128,512], index: 3, kind: input, shape index: {}]   ;;  %s501_s4 = inlined_call_operand.vmem [shape: f32[1,512], index: 4, kind: input, shape index: {}]   ;;  %s502_s5 = inlined_call_operand.hbm [shape: f32[1,512], index: 5, kind: input, shape index: {}]   ;;  %s503_s6 = inlined_call_operand.<no memory space> [shape: f32[1,1], index: 6, kind: input, shape index: {}]   ;;  %s504_s7 = inlined_call_operand.vmem [shape: f32[8,1], index: 7, kind: output, shape index: {}]  }
   0x1   :  { %v12_v0 = vstv %s503_s6 }
   0x2   :  { %13 = vst [vmem:[#allocation2] sm:$0x1] %v12_v0 }
   0x3   :  { %14 = vsyncpa [#allocation4], 0 }
   0x4   :  { %15 = vsyncpa [#allocation6], 0  ;;  %s32_s28 = sshll.u32 %s498_s1, 4  ;;  %s33_s28 = int_to_ptr.hbm [resolvable:$true] %s32_s28 }
   0x5   :  { %16 = vsyncpa [#allocation9], 0  ;;  %s425_s29 = smov [#allocation5]   ;;  %s22_s10 = sshll.u32 %s497_s0, 4  ;;  %s23_s10 = int_to_ptr.hbm [resolvable:$true] %s22_s10 }
   0x6   :  { %s34_s30 = sshll.u32 %s425_s29, 4  ;;  %s426_s11 = smov 128   ;;  %s35_s30 = int_to_ptr.vmem [resolvable:$true] %s34_s30 }
   0x7   :  { %s427_s12 = smov 8   ;;  %s428_s6 = smov [#allocation3]  }
   0x8   :  { %40 = dma.hbm_to_vmem [thread:$0]  %s33_s28, 512, %s35_s30, [#allocation6], %s426_s11, %s426_s11, %s427_s12  }
   0x9   :  { %s24_s13 = sshll.u32 %s428_s6, 4  ;;  %s47_s16 = sshll.u32 %s500_s3, 4  ;;  %s25_s13 = int_to_ptr.vmem [resolvable:$true] %s24_s13  ;;  %s48_s16 = int_to_ptr.hbm [resolvable:$true] %s47_s16 }
   0xa   :  { %27 = dma.hbm_to_vmem [thread:$0]  %s23_s10, 128, %s25_s13, [#allocation4]  }
   0xb   :  { %s429_s1 = smov [#allocation7]   ;;  %s63_s0 = sshll.u32 %s502_s5, 4  ;;  %s64_s0 = int_to_ptr.hbm [resolvable:$true] %s63_s0 }
   0xc   :  { %s49_s17 = sshll.u32 %s429_s1, 4  ;;  %s430_s20 = smov 512   ;;  %s50_s17 = int_to_ptr.vmem [resolvable:$true] %s49_s17 }
   0xd   :  { %s431_s21 = smov 32   ;;  %s432_s22 = smov [#allocation8]  }
   0xe   :  { %55 = dma.hbm_to_vmem [thread:$0]  %s48_s16, 8192, %s50_s17, [#allocation6], %s430_s20, %s430_s20, %s431_s21  }
   0xf   :  { %s65_s23 = sshll.u32 %s432_s22, 4  ;;  %s66_s23 = int_to_ptr.vmem [resolvable:$true] %s65_s23 }
  0x10   :  { %68 = dma.hbm_to_vmem [thread:$0]  %s64_s0, 64, %s66_s23, [#allocation9]  }
  0x11   :  { %419 = dma.done.wait [#allocation4], 128  }
  0x12   :  { %420 = vsyncadd [#allocation4], 4294967168 }
  0x13   :  { %421 = dma.done.wait [#allocation6], 8704  }
  0x14   :  { %422 = vsyncadd [#allocation6], 4294958592 }
  0x15   :  { %423 = dma.done.wait [#allocation9], 64  }
  0x16   :  { %424 = vsyncadd [#allocation9], 4294967232  ;;  %v91_v1 = vld [vmem:[#allocation5 + $0x18] sm:$0xff]  ;;  %v90_v2 = vld [vmem:[#allocation5 + $0x10] sm:$0xff]  ;;  %vm96_vm0 = vcmask 261120   ;;  %vm303_vm1 = vcmask 7168  }
  0x17   :  { %112 = vmatpush.msra.mxu0 %v91_v1  ;;  %v181_v3 = vld [vmem:[#allocation7 + $0x1e0] sm:$0xff]  ;;  %v89_v4 = vld [vmem:[#allocation5 + $0x8] sm:$0xff]  ;;  %v183_v6 = vld [vmem:[#allocation7 + $0x1f0] sm:$0xff] }
  0x18   :  { %195 = vmatpush.msra.mxu1 %v181_v3  ;;  %v182_v5 = vld [vmem:[#allocation7 + $0x1e8] sm:$0xff]  ;;  %v177_v7 = vld [vmem:[#allocation7 + $0x1c0] sm:$0xff]  ;;  %v179_v9 = vld [vmem:[#allocation7 + $0x1d0] sm:$0xff]  ;;  %235 = vmatpush.msra.mxu3 %v183_v6 }
  0x19   :  { %113 = vmatpush.msra.mxu0 %v90_v2  ;;  %215 = vmatpush.msra.mxu2 %v182_v5  ;;  %v178_v8 = vld [vmem:[#allocation7 + $0x1c8] sm:$0xff]  ;;  %v88_v10 = vld [vmem:[#allocation5] sm:$0xff]  ;;  %v87_v13 = vld [vmem:[#allocation3] sm:$0xff] }
  0x1a   :  { %196 = vmatpush.msra.mxu1 %v177_v7  ;;  %v173_v11 = vld [vmem:[#allocation7 + $0x1a0] sm:$0xff]  ;;  %v174_v12 = vld [vmem:[#allocation7 + $0x1a8] sm:$0xff]  ;;  %v175_v14 = vld [vmem:[#allocation7 + $0x1b0] sm:$0xff]  ;;  %236 = vmatpush.msra.mxu3 %v179_v9 }
  0x1b   :  { %114 = vmatpush.msra.mxu0 %v89_v4  ;;  %216 = vmatpush.msra.mxu2 %v178_v8  ;;  %v184_v15 = vld [vmem:[#allocation7 + $0x1f8] sm:$0xff]  ;;  %v169_v16 = vld [vmem:[#allocation7 + $0x180] sm:$0xff]  ;;  %v170_v17 = vld [vmem:[#allocation7 + $0x188] sm:$0xff] }
  0x1c   :  { %197 = vmatpush.msra.mxu1 %v173_v11  ;;  %v171_v18 = vld [vmem:[#allocation7 + $0x190] sm:$0xff]  ;;  %v180_v19 = vld [vmem:[#allocation7 + $0x1d8] sm:$0xff]  ;;  %237 = vmatpush.msra.mxu3 %v175_v14  ;;  %v165_v20 = vld [vmem:[#allocation7 + $0x160] sm:$0xff] }
  0x1d   :  { %115 = vmatpush.msra.mxu0 %v88_v10  ;;  %217 = vmatpush.msra.mxu2 %v174_v12  ;;  %v166_v21 = vld [vmem:[#allocation7 + $0x168] sm:$0xff]  ;;  %v167_v22 = vld [vmem:[#allocation7 + $0x170] sm:$0xff]  ;;  %v176_v23 = vld [vmem:[#allocation7 + $0x1b8] sm:$0xff] }
  0x1e   :  { %312 = vmatmul.msk.f32.vlgmr.msra.gmra.mxu0 %vm96_vm0, %v87_v13  ;;  %198 = vmatpush.msra.mxu1 %v169_v16  ;;  %v161_v24 = vld [vmem:[#allocation7 + $0x140] sm:$0xff]  ;;  %v162_v25 = vld [vmem:[#allocation7 + $0x148] sm:$0xff]  ;;  %v163_v26 = vld [vmem:[#allocation7 + $0x150] sm:$0xff] }
  0x1f   :  { %255 = vmatpush.msrb.mxu0 %v184_v15  ;;  %218 = vmatpush.msra.mxu2 %v170_v17  ;;  %v172_v27 = vld [vmem:[#allocation7 + $0x198] sm:$0xff]  ;;  %v157_v28 = vld [vmem:[#allocation7 + $0x120] sm:$0xff]  ;;  %v158_v29 = vld [vmem:[#allocation7 + $0x128] sm:$0xff] }
  0x20   :  { %238 = vmatpush.msra.mxu3 %v171_v18  ;;  %199 = vmatpush.msra.mxu1 %v165_v20  ;;  %v159_v30 = vld [vmem:[#allocation7 + $0x130] sm:$0xff]  ;;  %v168_v31 = vld [vmem:[#allocation7 + $0x178] sm:$0xff]  ;;  %v153_v32 = vld [vmem:[#allocation7 + $0x100] sm:$0xff] }
  0x21   :  { %256 = vmatpush.msrb.mxu0 %v180_v19  ;;  %219 = vmatpush.msra.mxu2 %v166_v21  ;;  %v154_v33 = vld [vmem:[#allocation7 + $0x108] sm:$0xff]  ;;  %v155_v34 = vld [vmem:[#allocation7 + $0x110] sm:$0xff]  ;;  %v164_v35 = vld [vmem:[#allocation7 + $0x158] sm:$0xff] }
  0x22   :  { %239 = vmatpush.msra.mxu3 %v167_v22  ;;  %200 = vmatpush.msra.mxu1 %v161_v24  ;;  %v149_v36 = vld [vmem:[#allocation7 + $0xe0] sm:$0xff]  ;;  %v150_v37 = vld [vmem:[#allocation7 + $0xe8] sm:$0xff]  ;;  %v151_v38 = vld [vmem:[#allocation7 + $0xf0] sm:$0xff] }
  0x23   :  { %257 = vmatpush.msrb.mxu0 %v176_v23  ;;  %220 = vmatpush.msra.mxu2 %v162_v25  ;;  %v160_v39 = vld [vmem:[#allocation7 + $0x138] sm:$0xff]  ;;  %v145_v40 = vld [vmem:[#allocation7 + $0xc0] sm:$0xff]  ;;  %v146_v41 = vld [vmem:[#allocation7 + $0xc8] sm:$0xff] }
  0x24   :  { %240 = vmatpush.msra.mxu3 %v163_v26  ;;  %201 = vmatpush.msra.mxu1 %v157_v28  ;;  %v147_v42 = vld [vmem:[#allocation7 + $0xd0] sm:$0xff]  ;;  %v156_v43 = vld [vmem:[#allocation7 + $0x118] sm:$0xff]  ;;  %v141_v44 = vld [vmem:[#allocation7 + $0xa0] sm:$0xff] }
  0x25   :  { %258 = vmatpush.msrb.mxu0 %v172_v27  ;;  %221 = vmatpush.msra.mxu2 %v158_v29  ;;  %v142_v45 = vld [vmem:[#allocation7 + $0xa8] sm:$0xff]  ;;  %v143_v46 = vld [vmem:[#allocation7 + $0xb0] sm:$0xff]  ;;  %v152_v47 = vld [vmem:[#allocation7 + $0xf8] sm:$0xff] }
  0x26   :  { %241 = vmatpush.msra.mxu3 %v159_v30  ;;  %202 = vmatpush.msra.mxu1 %v153_v32  ;;  %v137_v48 = vld [vmem:[#allocation7 + $0x80] sm:$0xff]  ;;  %v138_v49 = vld [vmem:[#allocation7 + $0x88] sm:$0xff]  ;;  %v139_v50 = vld [vmem:[#allocation7 + $0x90] sm:$0xff] }
  0x27   :  { %259 = vmatpush.msrb.mxu0 %v168_v31  ;;  %222 = vmatpush.msra.mxu2 %v154_v33  ;;  %v148_v51 = vld [vmem:[#allocation7 + $0xd8] sm:$0xff]  ;;  %v133_v52 = vld [vmem:[#allocation7 + $0x60] sm:$0xff]  ;;  %v134_v53 = vld [vmem:[#allocation7 + $0x68] sm:$0xff] }
  0x28   :  { %242 = vmatpush.msra.mxu3 %v155_v34  ;;  %203 = vmatpush.msra.mxu1 %v149_v36  ;;  %v135_v54 = vld [vmem:[#allocation7 + $0x70] sm:$0xff]  ;;  %v144_v55 = vld [vmem:[#allocation7 + $0xb8] sm:$0xff]  ;;  %v129_v58 = vld [vmem:[#allocation7 + $0x40] sm:$0xff] }
  0x29   :  { %260 = vmatpush.msrb.mxu0 %v164_v35  ;;  %223 = vmatpush.msra.mxu2 %v150_v37  ;;  %v140_v56 = vld [vmem:[#allocation7 + $0x98] sm:$0xff]  ;;  %v130_v59 = vld [vmem:[#allocation7 + $0x48] sm:$0xff]  ;;  %v131_v60 = vld [vmem:[#allocation7 + $0x50] sm:$0xff] }
  0x2a   :  { %243 = vmatpush.msra.mxu3 %v151_v38  ;;  %204 = vmatpush.msra.mxu1 %v145_v40  ;;  %v136_v57 = vld [vmem:[#allocation7 + $0x78] sm:$0xff]  ;;  %v125_v62 = vld [vmem:[#allocation7 + $0x20] sm:$0xff]  ;;  %v126_v63 = vld [vmem:[#allocation7 + $0x28] sm:$0xff] }
  0x2b   :  { %261 = vmatpush.msrb.mxu0 %v160_v39  ;;  %224 = vmatpush.msra.mxu2 %v146_v41  ;;  %v132_v61 = vld [vmem:[#allocation7 + $0x58] sm:$0xff]  ;;  %v127_v0 = vld [vmem:[#allocation7 + $0x30] sm:$0xff]  ;;  %v121_v2 = vld [vmem:[#allocation7] sm:$0xff] }
  0x2c   :  { %244 = vmatpush.msra.mxu3 %v147_v42  ;;  %205 = vmatpush.msra.mxu1 %v141_v44  ;;  %v128_v1 = vld [vmem:[#allocation7 + $0x38] sm:$0xff]  ;;  %v122_v3 = vld [vmem:[#allocation7 + $0x8] sm:$0xff]  ;;  %v123_v4 = vld [vmem:[#allocation7 + $0x10] sm:$0xff] }
  0x2d   :  { %262 = vmatpush.msrb.mxu0 %v156_v43  ;;  %225 = vmatpush.msra.mxu2 %v142_v45  ;;  %v124_v5 = vld [vmem:[#allocation7 + $0x18] sm:$0xff]  ;;  %v321_v6 = vld [vmem:[%s499_s2] ss:$0 sm:$0xff]  ;;  %v279_v14 = vld [vmem:[#allocation8] sm:$0xf] }
  0x2e   :  { %245 = vmatpush.msra.mxu3 %v143_v46  ;;  %206 = vmatpush.msra.mxu1 %v137_v48  ;;  %v185_v10 = vld [vmem:[%s501_s4] sm:$0xf]  ;;  %v281_v19 = vperm.slane %v279_v14, 0  ;;  %v282_v24 = vperm.slane %v279_v14, 1  ;;  %v283_v28 = vperm.slane %v279_v14, 2  ;;  %v284_v33 = vperm.slane %v279_v14, 3 }
  0x2f   :  { %263 = vmatpush.msrb.mxu0 %v152_v47  ;;  %226 = vmatpush.msra.mxu2 %v138_v49  ;;  %v187_v11 = vperm.slane %v185_v10, 0  ;;  %v190_v15 = vperm.slane %v185_v10, 3  ;;  %v188_v16 = vperm.slane %v185_v10, 1  ;;  %v189_v18 = vperm.slane %v185_v10, 2  ;;  %v322_v39 = vld [vmem:[#allocation2] ss:$0 sm:$0xff] }
  0x30   :  { %246 = vmatpush.msra.mxu3 %v139_v50  ;;  %207 = vmatpush.msra.mxu1 %v133_v52 }
  0x31   :  { %264 = vmatpush.msrb.mxu0 %v148_v51  ;;  %227 = vmatpush.msra.mxu2 %v134_v53 }
  0x32   :  { %247 = vmatpush.msra.mxu3 %v135_v54  ;;  %208 = vmatpush.msra.mxu1 %v129_v58 }
  0x33   :  { %265 = vmatpush.msrb.mxu0 %v144_v55  ;;  %228 = vmatpush.msra.mxu2 %v130_v59 }
  0x34   :  { %248 = vmatpush.msra.mxu3 %v131_v60  ;;  %209 = vmatpush.msra.mxu1 %v125_v62 }
  0x35   :  { %266 = vmatpush.msrb.mxu0 %v140_v56  ;;  %229 = vmatpush.msra.mxu2 %v126_v63 }
  0x36   :  { %249 = vmatpush.msra.mxu3 %v127_v0  ;;  %210 = vmatpush.msra.mxu1 %v121_v2 }
  0x37   :  { %267 = vmatpush.msrb.mxu0 %v136_v57  ;;  %230 = vmatpush.msra.mxu2 %v122_v3 }
  0x38   :  { %250 = vmatpush.msra.mxu3 %v123_v4 }
  0x39   :  { %268 = vmatpush.msrb.mxu0 %v132_v61 }
  0x3b   :  { %269 = vmatpush.msrb.mxu0 %v128_v1 }
  0x3d   :  { %270 = vmatpush.msrb.mxu0 %v124_v5 }
  0x9b   :  { %v117_v7 = vpop.f32.mrf.mxu0 }
  0x9c   :  { %v118_v8 = vadd.f32 %v321_v6, %v117_v7 }
  0x9e   :  { %v120_v9 = vmax.f32 %v118_v8, 0.0 }
  0xa0   :  { %211 = vmatmul.f32.vlgmr.msra.gmra.mxu1 %v120_v9  ;;  %231 = vmatmul.f32.vlgmr.msra.gmra.mxu2 %v120_v9 }
  0xa1   :  { %251 = vmatmul.f32.vlgmr.msra.gmra.mxu3 %v120_v9  ;;  %271 = vmatmul.f32.vlgmr.msrb.gmra.mxu0 %v120_v9 }
 0x11d   :  { %v212_v12 = vpop.f32.mrf.mxu1 }
 0x11e   :  { %v213_v13 = vadd.f32 %v212_v12, %v187_v11  ;;  %v272_v17 = vpop.f32.mrf.mxu0 }
 0x11f   :  { %v273_v22 = vadd.f32 %v272_v17, %v190_v15 }
 0x120   :  { %v275_v21 = vmax.f32 %v213_v13, 0.0 }
 0x121   :  { %v278_v31 = vmax.f32 %v273_v22, 0.0 }
 0x122   :  { %v289_v30 = vmul.f32 %v281_v19, %v275_v21 }
 0x123   :  { %v232_v20 = vpop.f32.mrf.mxu2  ;;  %v292_v36 = vmul.f32 %v284_v33, %v278_v31 }
 0x124   :  { %v233_v23 = vadd.f32 %v232_v20, %v188_v16  ;;  %v252_v25 = vpop.f32.mrf.mxu3 }
 0x125   :  { %v253_v26 = vadd.f32 %v252_v25, %v189_v18 }
 0x126   :  { %v276_v27 = vmax.f32 %v233_v23, 0.0 }
 0x127   :  { %v277_v29 = vmax.f32 %v253_v26, 0.0 }
 0x128   :  { %v290_v32 = vmul.f32 %v282_v24, %v276_v27 }
 0x129   :  { %v291_v34 = vmul.f32 %v283_v28, %v277_v29 }
 0x12a   :  { %v293_v35 = vadd.f32 %v290_v32, %v289_v30 }
 0x12c   :  { %v294_v37 = vadd.f32 %v293_v35, %v291_v34 }
 0x12e   :  { %v295_v38 = vadd.f32 %v294_v37, %v292_v36 }
 0x130   :  { %296 = vadd.xlane.f32.xlu0 %v295_v38 }
 0x1a3   :  { %v297_v40 = vpop.xlane.xlu0 %296 }
 0x1a4   :  { %v302_v41 = vadd.f32 %v322_v39, %v297_v40 }
 0x1a6   :  { %304 = vst.msk [vmem:[%s504_s7] sm:$0xff] %vm303_vm1, %v302_v41 }
 0x1a7   :  { %309 = vsyncpa [#allocation4], 1 }
 0x1a8   :  { %310 = vsyncpa [#allocation6], 1 }
 0x1a9   :  { %311 = vsyncpa [#allocation9], 1 }

</bundles_post_ra>
